<compile_context>
chip_gen: v5e
topology: v5e:2x2
jax: 0.10.0
libtpu: 0.0.40
codegen_flags: <defaults>
</compile_context>

<pallas_src>
import functools
import math

import jax
import jax.numpy as jnp
from jax.experimental import pallas as pl
from jax.experimental.pallas import tpu as pltpu

LANE = 128  # vreg lane width; every feature axis is padded to a multiple of this.


def _round_up(x, m):
    return ((x + m - 1) // m) * m


def _mlp_kernel(n_layers, *refs):
    """refs = (x_ref, w0_ref, b0_ref, w1_ref, b1_ref, ..., o_ref).

    All feature dims are pre-padded to multiples of 128, weights are bf16,
    biases f32. Whole MLP is fused: matmuls on the MXU (bf16 in, f32 acc),
    bias-add / ReLU on the VPU in f32.
    """
    x_ref = refs[0]
    o_ref = refs[-1]
    wb = refs[1:-1]

    h = x_ref[...].astype(jnp.float32)
    for li in range(n_layers):
        w = wb[2 * li][...]            # (in_p, out_p) bf16
        b = wb[2 * li + 1][...]        # (1, out_p)   f32, broadcasts over rows
        h = jnp.dot(h.astype(jnp.bfloat16), w,
                    preferred_element_type=jnp.float32) + b
        if li < n_layers - 1:          # ReLU after every Linear except the last
            h = jnp.maximum(h, 0.0)
    # Final layer is folded into the 128-padded scheme: padded weight columns /
    # bias entries are exact zeros, so columns >= 1 of h are zero and this store
    # is a full, unmasked lane-dense store. Column 0 is the real output.
    o_ref[...] = h.astype(o_ref.dtype)


def variable_net_forward(x, weights, biases, *, tile_b=128):
    """Forward pass of VariableNet.

    x:        (B, dim) float32
    weights:  list of (in_f, out_f) float32 arrays (last one has out_f == 1)
    biases:   list of (out_f,) float32 arrays
    Returns:  (B, 1) float32
    """
    B, dim = x.shape
    n_layers = len(weights)

    # --- pad batch to a multiple of tile_b, feature dims to multiples of 128 ---
    B_pad = _round_up(max(B, tile_b), tile_b)
    feat = [dim] + [w.shape[1] for w in weights]
    feat_p = [_round_up(f, LANE) for f in feat]

    x_pad = jnp.zeros((B_pad, feat_p[0]), x.dtype).at[:B, :dim].set(x)

    flat_params = []
    in_specs = [pl.BlockSpec((tile_b, feat_p[0]), lambda i: (i, 0))]
    for li, (w, b) in enumerate(zip(weights, biases)):
        in_f, out_f = w.shape
        in_p, out_p = feat_p[li], feat_p[li + 1]
        # Zero-pad and pre-cast weights to bf16 (halves weight DMA bytes, feeds
        # the MXU natively); biases stay f32 (added after the f32-accumulated matmul).
        w_p = jnp.zeros((in_p, out_p), jnp.bfloat16).at[:in_f, :out_f].set(
            w.astype(jnp.bfloat16))
        b_p = jnp.zeros((1, out_p), jnp.float32).at[0, :out_f].set(b)
        flat_params.append(w_p)
        flat_params.append(b_p)
        # Full-array blocks, constant index_map -> fetched once, resident across grid.
        in_specs.append(pl.BlockSpec((in_p, out_p), lambda i: (0, 0)))
        in_specs.append(pl.BlockSpec((1, out_p), lambda i: (0, 0)))

    out_p = feat_p[-1]  # padded final width (128), lane-dense output block
    out_specs = pl.BlockSpec((tile_b, out_p), lambda i: (i, 0))

    grid = (B_pad // tile_b,)
    kernel = functools.partial(_mlp_kernel, n_layers)

    out_padded = pl.pallas_call(
        kernel,
        out_shape=jax.ShapeDtypeStruct((B_pad, out_p), x.dtype),
        grid_spec=pltpu.PrefetchScalarGridSpec(
            num_scalar_prefetch=0,
            grid=grid,
            in_specs=in_specs,
            out_specs=out_specs,
        ),
        compiler_params=pltpu.CompilerParams(
            # Batch grid is embarrassingly parallel -> shards across v7x's 2 TCs.
            dimension_semantics=("parallel",),
            # Explicit VMEM budget (tiny here; for large layer_widths on v7x
            # (64 MiB VMEM) re-derive: 2*sum(in_p*out_p)*2B weights +
            # 2*tile_b*(dim + widest)*4B activations must fit).
            vmem_limit_bytes=32 * 1024 * 1024,
        ),
    )(x_pad, *flat_params)

    # Slice away batch padding and the zero-padded output lanes -> (B, 1).
    return out_padded[:B, :1]


def init_variable_net_params(key, dim, layer_widths):
    """Deterministic init matching nn.Linear's default U(-1/sqrt(fan_in), +...)."""
    dims = [dim] + list(layer_widths) + [1]
    weights, biases = [], []
    for li in range(len(dims) - 1):
        key, kw, kb = jax.random.split(key, 3)
        fan_in, fan_out = dims[li], dims[li + 1]
        bound = 1.0 / math.sqrt(fan_in)
        weights.append(
            jax.random.uniform(kw, (fan_in, fan_out), jnp.float32, -bound, bound))
        biases.append(
            jax.random.uniform(kb, (fan_out,), jnp.float32, -bound, bound))
    return key, weights, biases


if __name__ == "__main__":
    # Shapes consistent with the module: dim=32, layer_widths=[64, 32].
    # B=256 with tile_b=128 gives a 2-step parallel batch grid (engages both
    # TensorCores on v7x) while staying small.
    B, dim = 256, 32
    layer_widths = [64, 32]
    # dropout_rate defaults to False in VariableNet -> no Dropout layers.
    # TODO(synk): training-mode Dropout not implemented; eval/inference semantics
    # (identity) are what this kernel reproduces.

    key = jax.random.PRNGKey(0)
    key, weights, biases = init_variable_net_params(key, dim, layer_widths)

    key, kx = jax.random.split(key)
    x = jax.random.normal(kx, (B, dim), jnp.float32)

    y = variable_net_forward(x, weights, biases, tile_b=128)
    y = jax.block_until_ready(y)

    # Pure-JAX f32 reference for correctness (kernel uses bf16 MXU operands with
    # f32 accumulation, so tolerances are loosened accordingly).
    ref = x
    for li, (w, b) in enumerate(zip(weights, biases)):
        ref = ref @ w + b
        if li < len(weights) - 1:
            ref = jnp.maximum(ref, 0.0)

    assert y.shape == (B, 1), y.shape
    assert jnp.allclose(y, ref, atol=5e-2, rtol=5e-2), (
        "mismatch vs reference, max abs err = %f"
        % float(jnp.max(jnp.abs(y - ref))))
    print("KERNEL_OK")
</pallas_src>

<mosaic_0001>
module attributes {stable_mosaic.version = 11 : i64} {
  func.func @_mlp_kernel(%arg0: i32, %arg1: memref<128x128xf32, #tpu.memory_space<vmem>>, %arg2: memref<128x128xbf16, #tpu.memory_space<vmem>>, %arg3: memref<1x128xf32, #tpu.memory_space<vmem>>, %arg4: memref<128x128xbf16, #tpu.memory_space<vmem>>, %arg5: memref<1x128xf32, #tpu.memory_space<vmem>>, %arg6: memref<128x128xbf16, #tpu.memory_space<vmem>>, %arg7: memref<1x128xf32, #tpu.memory_space<vmem>>, %arg8: memref<128x128xf32, #tpu.memory_space<vmem>>) attributes {dimension_semantics = [#tpu.dimension_semantics<parallel>], iteration_bounds = array<i64: 2>, scalar_prefetch = 0 : i64, scratch_operands = 0 : i64, tpu.core_type = #tpu.core_type<tc>, window_params = [{transform_indices = @transform_0, window_bounds = array<i64: 128, 128>}, {pipeline_mode = #tpu.pipeline_mode<synchronous>, transform_indices = @transform_1, window_bounds = array<i64: 128, 128>}, {pipeline_mode = #tpu.pipeline_mode<synchronous>, transform_indices = @transform_2, window_bounds = array<i64: 1, 128>}, {pipeline_mode = #tpu.pipeline_mode<synchronous>, transform_indices = @transform_3, window_bounds = array<i64: 128, 128>}, {pipeline_mode = #tpu.pipeline_mode<synchronous>, transform_indices = @transform_4, window_bounds = array<i64: 1, 128>}, {pipeline_mode = #tpu.pipeline_mode<synchronous>, transform_indices = @transform_5, window_bounds = array<i64: 128, 128>}, {pipeline_mode = #tpu.pipeline_mode<synchronous>, transform_indices = @transform_6, window_bounds = array<i64: 1, 128>}, {transform_indices = @transform_7, window_bounds = array<i64: 128, 128>}]} {
    %c0 = arith.constant 0 : index
    %c0_0 = arith.constant 0 : index
    %0 = vector.load %arg1[%c0, %c0_0] : memref<128x128xf32, #tpu.memory_space<vmem>>, vector<128x128xf32>
    %c0_1 = arith.constant 0 : index
    %c0_2 = arith.constant 0 : index
    %1 = vector.load %arg2[%c0_1, %c0_2] : memref<128x128xbf16, #tpu.memory_space<vmem>>, vector<128x128xbf16>
    %c0_3 = arith.constant 0 : index
    %c0_4 = arith.constant 0 : index
    %2 = vector.load %arg3[%c0_3, %c0_4] : memref<1x128xf32, #tpu.memory_space<vmem>>, vector<1x128xf32>
    %3 = arith.truncf %0 : vector<128x128xf32> to vector<128x128xbf16>
    %cst = arith.constant dense<0.000000e+00> : vector<128x128xf32>
    %4 = tpu.matmul %3, %1, %cst {dimension_numbers = #tpu.dot_dimension_numbers<[1], [0], [0], [1], [0, 0, 1, 1], [], []>} : vector<128x128xbf16>, vector<128x128xbf16>, vector<128x128xf32> -> vector<128x128xf32>
    %5 = vector.broadcast %2 : vector<1x128xf32> to vector<128x128xf32>
    %6 = arith.addf %4, %5 : vector<128x128xf32>
    %cst_5 = arith.constant 0.000000e+00 : f32
    %7 = vector.broadcast %cst_5 : f32 to vector<128x128xf32>
    %8 = arith.maximumf %6, %7 : vector<128x128xf32>
    %c0_6 = arith.constant 0 : index
    %c0_7 = arith.constant 0 : index
    %9 = vector.load %arg4[%c0_6, %c0_7] : memref<128x128xbf16, #tpu.memory_space<vmem>>, vector<128x128xbf16>
    %c0_8 = arith.constant 0 : index
    %c0_9 = arith.constant 0 : index
    %10 = vector.load %arg5[%c0_8, %c0_9] : memref<1x128xf32, #tpu.memory_space<vmem>>, vector<1x128xf32>
    %11 = arith.truncf %8 : vector<128x128xf32> to vector<128x128xbf16>
    %cst_10 = arith.constant dense<0.000000e+00> : vector<128x128xf32>
    %12 = tpu.matmul %11, %9, %cst_10 {dimension_numbers = #tpu.dot_dimension_numbers<[1], [0], [0], [1], [0, 0, 1, 1], [], []>} : vector<128x128xbf16>, vector<128x128xbf16>, vector<128x128xf32> -> vector<128x128xf32>
    %13 = vector.broadcast %10 : vector<1x128xf32> to vector<128x128xf32>
    %14 = arith.addf %12, %13 : vector<128x128xf32>
    %cst_11 = arith.constant 0.000000e+00 : f32
    %15 = vector.broadcast %cst_11 : f32 to vector<128x128xf32>
    %16 = arith.maximumf %14, %15 : vector<128x128xf32>
    %c0_12 = arith.constant 0 : index
    %c0_13 = arith.constant 0 : index
    %17 = vector.load %arg6[%c0_12, %c0_13] : memref<128x128xbf16, #tpu.memory_space<vmem>>, vector<128x128xbf16>
    %c0_14 = arith.constant 0 : index
    %c0_15 = arith.constant 0 : index
    %18 = vector.load %arg7[%c0_14, %c0_15] : memref<1x128xf32, #tpu.memory_space<vmem>>, vector<1x128xf32>
    %19 = arith.truncf %16 : vector<128x128xf32> to vector<128x128xbf16>
    %cst_16 = arith.constant dense<0.000000e+00> : vector<128x128xf32>
    %20 = tpu.matmul %19, %17, %cst_16 {dimension_numbers = #tpu.dot_dimension_numbers<[1], [0], [0], [1], [0, 0, 1, 1], [], []>} : vector<128x128xbf16>, vector<128x128xbf16>, vector<128x128xf32> -> vector<128x128xf32>
    %21 = vector.broadcast %18 : vector<1x128xf32> to vector<128x128xf32>
    %22 = arith.addf %20, %21 : vector<128x128xf32>
    %c0_17 = arith.constant 0 : index
    %c0_18 = arith.constant 0 : index
    %23 = vector.load %arg8[%c0_17, %c0_18] : memref<128x128xf32, #tpu.memory_space<vmem>>, vector<128x128xf32>
    tpu.vector_store %arg8[%c0_17, %c0_18], %22 {strides = array<i32>} : memref<128x128xf32, #tpu.memory_space<vmem>>, vector<128x128xf32>,
    return
  }
  func.func @transform_0(%arg0: i32) -> (i32, i32) {
    %c0_i32 = arith.constant 0 : i32
    %c0_i32_0 = arith.constant 0 : i32
    return %arg0, %c0_i32 : i32, i32
  }
  func.func @transform_1(%arg0: i32) -> (i32, i32) {
    %c0_i32 = arith.constant 0 : i32
    %c0_i32_0 = arith.constant 0 : i32
    %c0_i32_1 = arith.constant 0 : i32
    return %c0_i32, %c0_i32_0 : i32, i32
  }
  func.func @transform_2(%arg0: i32) -> (i32, i32) {
    %c0_i32 = arith.constant 0 : i32
    %c0_i32_0 = arith.constant 0 : i32
    %c0_i32_1 = arith.constant 0 : i32
    return %c0_i32, %c0_i32_0 : i32, i32
  }
  func.func @transform_3(%arg0: i32) -> (i32, i32) {
    %c0_i32 = arith.constant 0 : i32
    %c0_i32_0 = arith.constant 0 : i32
    %c0_i32_1 = arith.constant 0 : i32
    return %c0_i32, %c0_i32_0 : i32, i32
  }
  func.func @transform_4(%arg0: i32) -> (i32, i32) {
    %c0_i32 = arith.constant 0 : i32
    %c0_i32_0 = arith.constant 0 : i32
    %c0_i32_1 = arith.constant 0 : i32
    return %c0_i32, %c0_i32_0 : i32, i32
  }
  func.func @transform_5(%arg0: i32) -> (i32, i32) {
    %c0_i32 = arith.constant 0 : i32
    %c0_i32_0 = arith.constant 0 : i32
    %c0_i32_1 = arith.constant 0 : i32
    return %c0_i32, %c0_i32_0 : i32, i32
  }
  func.func @transform_6(%arg0: i32) -> (i32, i32) {
    %c0_i32 = arith.constant 0 : i32
    %c0_i32_0 = arith.constant 0 : i32
    %c0_i32_1 = arith.constant 0 : i32
    return %c0_i32, %c0_i32_0 : i32, i32
  }
  func.func @transform_7(%arg0: i32) -> (i32, i32) {
    %c0_i32 = arith.constant 0 : i32
    %c0_i32_0 = arith.constant 0 : i32
    return %arg0, %c0_i32 : i32, i32
  }
}

</mosaic_0001>

<bundles_post_ra>
// kernel: tpu_custom_call.1
= control target key start
LH: loop header
LB: loop body
LE: loop exit
PB: predicated region body
PF: predicated region fallthrough
CT: control target
= control target key end

     0   :  { %s1633_s0 = inlined_call_operand.hbm [shape: f32[256,128], index: 0, kind: input, shape index: {}]   ;;  %s1634_s1 = inlined_call_operand.hbm [shape: bf16[128,128], index: 1, kind: input, shape index: {}]   ;;  %s1635_s2 = inlined_call_operand.vmem [shape: f32[1,128], index: 2, kind: input, shape index: {}]   ;;  %s1636_s3 = inlined_call_operand.hbm [shape: bf16[128,128], index: 3, kind: input, shape index: {}]   ;;  %s1637_s4 = inlined_call_operand.vmem [shape: f32[1,128], index: 4, kind: input, shape index: {}]   ;;  %s1638_s5 = inlined_call_operand.hbm [shape: bf16[128,128], index: 5, kind: input, shape index: {}]   ;;  %s1639_s6 = inlined_call_operand.vmem [shape: f32[1,128], index: 6, kind: input, shape index: {}]   ;;  %s1640_s7 = inlined_call_operand.hbm [shape: f32[256,128], index: 7, kind: output, shape index: {}]  }
   0x1   :  { %1641 = sst [smem:[#allocation15_spill]] %s1634_s1 }
   0x2   :  { %12 = vsyncpa [#allocation3], 0 }
   0x3   :  { %14 = vsyncpa [#allocation3 + $0x1], 0 }
   0x4   :  { %15 = vsyncpa [#allocation6], 0 }
   0x5   :  { %16 = vsyncpa [#allocation9], 0 }
   0x6   :  { %17 = vsyncpa [#allocation4], 0 }
   0x7   :  { %19 = vsyncpa [#allocation4 + $0x1], 0  ;;  %s1405_s24 = smov 0   ;;  %s1407_s25 = smov 0  }
   0x8   :  { %s1409_s26 = smov 0   ;;  %s1411_s27 = smov 0  }
   0x9 LB: > { %s1426_s28 = sadd.s32 4294967295, %s1354_s27   ;;  %s908_s29 = sadd.s32 4294967294, %s1354_s27   ;;  %s1354_s27 = sphi %s1411_s27, %s1653_s27   ;;  %s1350_s26 = sphi %s1409_s26, %s1652_s26   ;;  %s1346_s25 = sphi %s1407_s25, %s1651_s25   ;;  %s1342_s24 = sphi %s1405_s24, %s1650_s24  }
   0xa   : > { %p45_p0 = scmp.ne.s32.totalorder %s1346_s25, %s1342_s24  ;;  %p46_p1 = scmp.eq.s32.totalorder %s1426_s28, 0 }
   0xb   : > { %p195_p2 = scmp.eq.s32.totalorder %s1426_s28, 1  ;;  %p201_p3 = scmp.eq.s32.totalorder %s908_s29, 1 }
   0xc   : > { %p1435_p4 = por %p46_p1, %p45_p0  ;;  %p909_p5 = scmp.ge.s32.totalorder %s1354_s27, 1 }
   0xd   : > { %p1440_p6 = por %p201_p3, %p45_p0  ;;  %p208_p7 = scmp.lt.s32.totalorder %s1354_s27, 3 }
   0xe   : > { %s1644_s1 = sld [smem:[#allocation15_spill]]  ;;  %s1356_s13 = smov [#allocation5]  }
   0xf   : > { %p1448_p8 = pnand %p909_p5, %p208_p7  ;;  %s221_s14 = sshll.u32 %s1356_s13, 4  ;;  %s222_s14 = int_to_ptr.vmem [resolvable:$true] %s221_s14 }
  0x10   : > { %s236_s18 = sshll.u32 %s1636_s3, 4  ;;  %s1357_s19 = smov 64   ;;  %s237_s18 = int_to_ptr.hbm [resolvable:$true] %s236_s18 }
  0x11   : > { %p1090_p9 = pneg %p1448_p8  ;;  %s1358_s20 = smov 4  }
  0x12   : > { %s1359_s21 = smov [#allocation7]   ;;  %s253_s9 = sshll.u32 %s1638_s5, 4  ;;  %s254_s9 = int_to_ptr.hbm [resolvable:$true] %s253_s9 }
  0x13   : > { %p1456_p10 = pnand %p1090_p9, %p46_p1  ;;  %s238_s22 = sshll.u32 %s1359_s21, 4  ;;  %s239_s22 = int_to_ptr.vmem [resolvable:$true] %s238_s22 }
  0x14   : > { %s219_s11 = sshll.u32 %s1644_s1, 4  ;;  %s1360_s10 = smov [#allocation8]   ;;  %s220_s11 = int_to_ptr.hbm [resolvable:$true] %s219_s11 }
  0x15   : > { %1093 = dma.hbm_to_vmem [thread:$0]  (!%p1456_p10), %s220_s11, 1024, %s222_s14, [#allocation6], %s1357_s19, %s1357_s19, %s1358_s20  }
  0x16   : > { %1096 = dma.hbm_to_vmem [thread:$0]  (!%p1456_p10), %s237_s18, 1024, %s239_s22, [#allocation6], %s1357_s19, %s1357_s19, %s1358_s20  }
  0x17   : > { %s255_s13 = sshll.u32 %s1360_s10, 4  ;;  %s1472_s11 = sadd.s32 1, %s1354_s27   ;;  %s256_s13 = int_to_ptr.vmem [resolvable:$true] %s255_s13 }
  0x18   : > { %1099 = dma.hbm_to_vmem [thread:$0]  (!%p1456_p10), %s254_s9, 1024, %s256_s13, [#allocation9], %s1357_s19, %s1357_s19, %s1358_s20  }
  0x19   : > { %s29_s14 = ssub.s32 %s1354_s27, %s1472_s11  ;;  %s32_s16 = sadd.s32 1, %s1350_s26 }
  0x1a   : > { %p30_p12 = scmp.eq.s32.totalorder %s29_s14, 0  ;;  %p39_p13 = scmp.ne.s32.totalorder %s1350_s26, %s1346_s25 }
  0x1b   : > { %p40_p0 = scmp.eq.s32.totalorder %s1354_s27, 0  ;;  %p1111_p3 = scmp.lt.s32.totalorder %s1354_s27, 2 }
  0x1c   : > { %s1484_s17 = scalar_select %p30_p12, %s1350_s26, %s32_s16  }
  0x1d   : > { %p41_p5 = por %p40_p0, %p39_p13  ;;  %p1488_p7 = por %p195_p2, %p39_p13 }
  0x1e   : > { %s272_s21 = sand.u32 1, %s1350_s26   ;;  %s1024_s22 = sshll.u32 %s1354_s27, 7 }
  0x1f   : > { %s914_s15 = sshll.u32 %s272_s21, 7  ;;  %s281_s20 = scalar_lea.hbm %s1633_s0, %s1024_s22 }
  0x20   : > { %s282_s29 = sshll.u32 %s281_s20, 4  ;;  %s276_s9 = scalar_lea.vmem [#allocation2], %s914_s15  ;;  %s283_s29 = int_to_ptr.hbm [resolvable:$true] %s282_s29 }
  0x21   : > { %s284_s10 = sshll.u32 %s276_s9, 4  ;;  %p1499_p9 = pnand %p1111_p3, %p41_p5  ;;  %s285_s10 = int_to_ptr.vmem [resolvable:$true] %s284_s10 }
  0x22   : > { %s273_s14 = scalar_lea.sflag [#allocation3], %s272_s21  ;;  %s1250_s16 = sshra.s32 %s283_s29, 4  ;;  %s1251_s16 = int_to_ptr.hbm [resolvable:$true] %s1250_s16 }
  0x23   : > { %s1252_s1 = scalar_lea.hbm %s1251_s16, 128  ;;  %p1254_p10 = pneg %p1499_p9 }
  0x24   : > { %p1253_p2 = scmp.ne.s32.totalorder %s1251_s16, %s1252_s1  ;;  %s1257_s23 = scalar_lea.hbm %s1633_s0, 256 }
  0x25   : > { %p1258_p0 = scmp.lt.s32.totalorder %s1251_s16, %s1633_s0  ;;  %p1259_p3 = scmp.lt.s32.totalorder %s1257_s23, %s1252_s1 }
  0x26   : > { %p1255_p12 = pnand %p1254_p10, %p1253_p2 }
  0x27   : > { %p1260_p5 = por %p1259_p3, %p1258_p0 }
  0x28   : > { %p1256_p13 = pneg %p1255_p12 }
  0x2a   : > { %p1261_p11 = pnand %p1260_p5, %p1256_p13 }
  0x2c   : > { %1264 = shalt.err (!%p1261_p11)
}
  0x2d   : > { %s1361_s21 = smov 128   ;;  %s1362_s9 = smov 8  }
  0x2e   : > { %1103 = dma.hbm_to_vmem [thread:$0]  (!%p1499_p9), %s283_s29, 2048, %s285_s10, %s273_s14, %s1361_s21, %s1361_s21, %s1362_s9  }
  0x2f   : > { %296 = sbr.rel (%p1448_p8) target bundleno = 595 (0x253), region = 48  ;;  %s1516_s22 = sand.u32 (!%p1448_p8), 1, %s1346_s25  }
  0x30   : > { %s918_s16 = sshll.u32 (!%p1448_p8), %s1516_s22, 7  ;;  %s299_s1 = scalar_lea.sflag (!%p1448_p8), [#allocation3], %s1516_s22 }
  0x31   : > { %s1522_s15 = scalar_lea.vmem (!%p1448_p8), [#allocation2], %s918_s16 }
  0x34   : > { %1325 = dma.done.wait (%p1435_p4), %s299_s1, 2048  }
  0x35   : > { %1327 = vsyncadd (%p1435_p4), %s299_s1, 4294965248 }
  0x36   : > { %1329 = dma.done.wait (%p46_p1), [#allocation6], 2048  }
  0x37   : > { %1331 = vsyncadd (%p46_p1), [#allocation6], 4294965248 }
  0x38   : > { %1333 = dma.done.wait (%p46_p1), [#allocation9], 1024  }
  0x39   : > { %1335 = vsyncadd (%p46_p1), [#allocation9], 4294966272  ;;  %v1032_v0 = vld [vmem:[#allocation5 + $0x38] sm:$0xff]  ;;  %v1031_v1 = vld [vmem:[#allocation5 + $0x30] sm:$0xff]  ;;  %s1581_s23 = scalar_lea.vmem [#allocation10], %s918_s16  ;;  %s1049_s19 = sshll.u32 %s1426_s28, 7 }
  0x3a   : > { %443 = vmatpush.bf16.msra.mxu0 %v1032_v0  ;;  %1050 = vmatpush.bf16.msra.mxu3 %v1032_v0  ;;  %v1030_v2 = vld [vmem:[#allocation5 + $0x28] sm:$0xff]  ;;  %v1029_v3 = vld [vmem:[#allocation5 + $0x20] sm:$0xff]  ;;  %v1028_v4 = vld [vmem:[#allocation5 + $0x18] sm:$0xff]  ;;  %s802_s9 = scalar_lea.hbm %s1640_s7, %s1049_s19  ;;  %s803_s16 = sshll.u32 %s1581_s23, 4  ;;  %s804_s16 = int_to_ptr.vmem [resolvable:$true] %s803_s16 }
  0x3b   : > { %v1027_v5 = vld [vmem:[#allocation5 + $0x10] sm:$0xff]  ;;  %v1026_v6 = vld [vmem:[#allocation5 + $0x8] sm:$0xff]  ;;  %v1025_v7 = vld [vmem:[#allocation5] sm:$0xff]  ;;  %s805_s1 = sshll.u32 %s802_s9, 4  ;;  %s1300_s10 = scalar_lea.hbm %s1640_s7, 256  ;;  %s806_s1 = int_to_ptr.hbm [resolvable:$true] %s805_s1 }
  0x3c   : > { %v351_v8 = vld [vmem:[%s1522_s15] sm:$0xff]  ;;  %v352_v9 = vld [vmem:[%s1522_s15 + $0x8] sm:$0xff]  ;;  %v353_v14 = vld [vmem:[%s1522_s15 + $0x10] sm:$0xff]  ;;  %s1294_s30 = sshra.s32 %s806_s1, 4  ;;  %s1295_s30 = int_to_ptr.hbm [resolvable:$true] %s1294_s30 }
  0x3d   : > { %v363_v10 = vld [vmem:[%s1522_s15 + $0x60] sm:$0xff]  ;;  %v364_v11 = vld [vmem:[%s1522_s15 + $0x68] sm:$0xff]  ;;  %v384_v12 = vpack.c.bf16 %v352_v9, %v351_v8  ;;  %v354_v15 = vld [vmem:[%s1522_s15 + $0x18] sm:$0xff]  ;;  %s1296_s12 = scalar_lea.hbm %s1295_s30, 128  ;;  %p1301_p11 = scmp.lt.s32.totalorder %s1295_s30, %s1640_s7 }
  0x3e   : > { %444 = vmatpush.bf16.msra.mxu0 %v1031_v1  ;;  %1051 = vmatpush.bf16.msra.mxu3 %v1031_v1  ;;  %v390_v13 = vpack.c.bf16 %v364_v11, %v363_v10  ;;  %v365_v16 = vld [vmem:[%s1522_s15 + $0x70] sm:$0xff]  ;;  %v366_v17 = vld [vmem:[%s1522_s15 + $0x78] sm:$0xff]  ;;  %v385_v18 = vpack.c.bf16 %v354_v15, %v353_v14  ;;  %v355_v20 = vld [vmem:[%s1522_s15 + $0x20] sm:$0xff]  ;;  %p1297_p1 = scmp.ne.s32.totalorder %s1295_s30, %s1296_s12  ;;  %p1302_p9 = scmp.lt.s32.totalorder %s1300_s10, %s1296_s12 }
  0x3f   : > { %v391_v19 = vpack.c.bf16 %v366_v17, %v365_v16  ;;  %v356_v21 = vld [vmem:[%s1522_s15 + $0x28] sm:$0xff]  ;;  %v357_v23 = vld [vmem:[%s1522_s15 + $0x30] sm:$0xff]  ;;  %v358_v24 = vld [vmem:[%s1522_s15 + $0x38] sm:$0xff] }
  0x40   : > { %v386_v22 = vpack.c.bf16 %v356_v21, %v355_v20  ;;  %v387_v25 = vpack.c.bf16 %v358_v24, %v357_v23  ;;  %v1040_v26 = vld [vmem:[#allocation7 + $0x38] sm:$0xff]  ;;  %v1039_v27 = vld [vmem:[#allocation7 + $0x30] sm:$0xff]  ;;  %v1038_v28 = vld [vmem:[#allocation7 + $0x28] sm:$0xff]  ;;  %p1298_p4 = pnand %p1297_p1, %p1488_p7  ;;  %p1303_p2 = por %p1302_p9, %p1301_p11 }
  0x41   : > { %584 = vmatpush.bf16.msra.mxu1 %v1040_v26  ;;  %v359_v29 = vld [vmem:[%s1522_s15 + $0x40] sm:$0xff]  ;;  %v360_v30 = vld [vmem:[%s1522_s15 + $0x48] sm:$0xff]  ;;  %v361_v33 = vld [vmem:[%s1522_s15 + $0x50] sm:$0xff] }
  0x42   : > { %445 = vmatpush.bf16.msra.mxu0 %v1030_v2  ;;  %1052 = vmatpush.bf16.msra.mxu3 %v1030_v2  ;;  %v1037_v31 = vld [vmem:[#allocation7 + $0x20] sm:$0xff]  ;;  %v388_v32 = vpack.c.bf16 %v360_v30, %v359_v29  ;;  %v362_v34 = vld [vmem:[%s1522_s15 + $0x58] sm:$0xff]  ;;  %v1035_v37 = vld [vmem:[#allocation7 + $0x10] sm:$0xff]  ;;  %s791_s15 = scalar_lea.sflag [#allocation4], %s1516_s22  ;;  %p1299_p8 = pneg %p1298_p4 }
  0x43   : > { %v389_v35 = vpack.c.bf16 %v362_v34, %v361_v33  ;;  %v1036_v36 = vld [vmem:[#allocation7 + $0x18] sm:$0xff]  ;;  %v1034_v38 = vld [vmem:[#allocation7 + $0x8] sm:$0xff]  ;;  %v1033_v39 = vld [vmem:[#allocation7] sm:$0xff] }
  0x44   : > { %v1555_v41 = vld [vmem:[%s1635_s2] ss:$0 sm:$0xff]  ;;  %v1047_v21 = vld [vmem:[#allocation8 + $0x30] sm:$0xff]  ;;  %p1304_p10 = pnand %p1303_p2, %p1299_p8 }
  0x45   : > { %585 = vmatpush.bf16.msra.mxu1 %v1039_v27 }
  0x46   : > { %446 = vmatpush.bf16.msra.mxu0 %v1029_v3  ;;  %1053 = vmatpush.bf16.msra.mxu3 %v1029_v3 }
  0x49   : > { %586 = vmatpush.bf16.msra.mxu1 %v1038_v28 }
  0x4a   : > { %447 = vmatpush.bf16.msra.mxu0 %v1028_v4  ;;  %1054 = vmatpush.bf16.msra.mxu3 %v1028_v4 }
  0x4d   : > { %587 = vmatpush.bf16.msra.mxu1 %v1037_v31 }
  0x4e   : > { %448 = vmatpush.bf16.msra.mxu0 %v1027_v5  ;;  %1055 = vmatpush.bf16.msra.mxu3 %v1027_v5 }
  0x51   : > { %588 = vmatpush.bf16.msra.mxu1 %v1036_v36 }
  0x52   : > { %449 = vmatpush.bf16.msra.mxu0 %v1026_v6  ;;  %1056 = vmatpush.bf16.msra.mxu3 %v1026_v6 }
  0x55   : > { %589 = vmatpush.bf16.msra.mxu1 %v1035_v37 }
  0x56   : > { %450 = vmatpush.bf16.msra.mxu0 %v1025_v7  ;;  %1057 = vmatpush.bf16.msra.mxu3 %v1025_v7 }
  0x59   : > { %451 = vmatmul.bf16.vlgmr.msra.gmra.mxu0 %v384_v12  ;;  %481 = vmatmul.bf16.vlgmr.msra.gmra.mxu3 %v390_v13 }
  0x5a   : > { %1058 = vmatpush.bf16.msrb.mxu3 %v1040_v26  ;;  %590 = vmatpush.bf16.msra.mxu1 %v1034_v38  ;;  %v1045_v26 = vld [vmem:[#allocation8 + $0x20] sm:$0xff] }
  0x5e   : > { %1059 = vmatpush.bf16.msrb.mxu3 %v1039_v27  ;;  %591 = vmatpush.bf16.msra.mxu1 %v1033_v39 }
  0x62   : > { %1060 = vmatpush.bf16.msrb.mxu3 %v1038_v28 }
  0x66   : > { %1061 = vmatpush.bf16.msrb.mxu3 %v1037_v31 }
  0x69   : > { %456 = vmatmul.bf16.gmra.mxu0 %v385_v18  ;;  %486 = vmatmul.bf16.gmra.mxu3 %v391_v19  ;;  %v1048_v19 = vld [vmem:[#allocation8 + $0x38] sm:$0xff] }
  0x6a   : > { %1062 = vmatpush.bf16.msrb.mxu3 %v1036_v36  ;;  %725 = vmatpush.bf16.msra.mxu2 %v1048_v19 }
  0x6e   : > { %1063 = vmatpush.bf16.msrb.mxu3 %v1035_v37  ;;  %726 = vmatpush.bf16.msra.mxu2 %v1047_v21  ;;  %v1044_v37 = vld [vmem:[#allocation8 + $0x18] sm:$0xff] }
  0x72   : > { %1064 = vmatpush.bf16.msrb.mxu3 %v1034_v38  ;;  %v1043_v38 = vld [vmem:[#allocation8 + $0x10] sm:$0xff] }
  0x76   : > { %1065 = vmatpush.bf16.msrb.mxu3 %v1033_v39  ;;  %v1042_v39 = vld [vmem:[#allocation8 + $0x8] sm:$0xff] }
  0x79   : > { %461 = vmatmul.bf16.gmra.mxu0 %v386_v22  ;;  %v1046_v22 = vld [vmem:[#allocation8 + $0x28] sm:$0xff] }
  0x7a   : > { %1066 = vmatpush.bf16.msra.mxu3 %v1048_v19  ;;  %727 = vmatpush.bf16.msra.mxu2 %v1046_v22 }
  0x7e   : > { %1067 = vmatpush.bf16.msra.mxu3 %v1047_v21  ;;  %728 = vmatpush.bf16.msra.mxu2 %v1045_v26 }
  0x82   : > { %1068 = vmatpush.bf16.msra.mxu3 %v1046_v22  ;;  %729 = vmatpush.bf16.msra.mxu2 %v1044_v37 }
  0x86   : > { %1069 = vmatpush.bf16.msra.mxu3 %v1045_v26  ;;  %730 = vmatpush.bf16.msra.mxu2 %v1043_v38 }
  0x89   : > { %466 = vmatmul.bf16.gmra.mxu0 %v387_v25 }
  0x8a   : > { %1070 = vmatpush.bf16.msra.mxu3 %v1044_v37  ;;  %731 = vmatpush.bf16.msra.mxu2 %v1042_v39 }
  0x8e   : > { %1071 = vmatpush.bf16.msra.mxu3 %v1043_v38 }
  0x92   : > { %1072 = vmatpush.bf16.msra.mxu3 %v1042_v39 }
  0x99   : > { %471 = vmatmul.bf16.gmra.mxu0 %v388_v32 }
  0xa9   : > { %476 = vmatmul.bf16.gmra.mxu0 %v389_v35 }
  0xd6   : > { %v452_v40 = vpop.f32.mrf.mxu0 }
  0xd7   : > { %v453_v43 = vadd.f32 %v1555_v41, %v452_v40  ;;  %v1041_v40 = vld [vmem:[#allocation8] sm:$0xff] }
  0xd8   : > { %732 = vmatpush.bf16.msra.mxu2 %v1041_v40  ;;  %1073 = vmatpush.bf16.msra.mxu3 %v1041_v40 }
  0xd9   : > { %v492_v46 = vmax.f32 %v453_v43, 0.0 }
  0xdc   : > { %v482_v42 = vpop.f32.mrf.mxu3 }
  0xdd   : > { %v483_v48 = vadd.f32 %v1555_v41, %v482_v42 }
  0xde   : > { %v454_v44 = vpop.f32.mrf.mxu0 }
  0xdf   : > { %v455_v45 = vadd.f32 %v1555_v41, %v454_v44  ;;  %v504_v51 = vmax.f32 %v483_v48, 0.0 }
  0xe1   : > { %v493_v47 = vmax.f32 %v455_v45, 0.0 }
  0xe3   : > { %v525_v49 = vpack.c.bf16 %v493_v47, %v492_v46 }
  0xe4   : > { %v484_v50 = vpop.f32.mrf.mxu3 }
  0xe5   : > { %592 = vmatmul.bf16.vlgmr.msra.gmra.mxu1 %v525_v49  ;;  %v485_v52 = vadd.f32 %v1555_v41, %v484_v50 }
  0xe6   : > { %v457_v53 = vpop.f32.mrf.mxu0 }
  0xe7   : > { %v505_v54 = vmax.f32 %v485_v52, 0.0  ;;  %v458_v57 = vadd.f32 %v1555_v41, %v457_v53 }
  0xe9   : > { %v531_v55 = vpack.c.bf16 %v505_v54, %v504_v51  ;;  %v494_v60 = vmax.f32 %v458_v57, 0.0 }
  0xeb   : > { %622 = vmatmul.bf16.vlgmr.msrb.gmra.mxu3 %v531_v55 }
  0xec   : > { %v487_v56 = vpop.f32.mrf.mxu3 }
  0xed   : > { %v488_v62 = vadd.f32 %v1555_v41, %v487_v56 }
  0xee   : > { %v459_v58 = vpop.f32.mrf.mxu0 }
  0xef   : > { %v460_v59 = vadd.f32 %v1555_v41, %v459_v58  ;;  %v506_v1 = vmax.f32 %v488_v62, 0.0 }
  0xf1   : > { %v495_v61 = vmax.f32 %v460_v59, 0.0 }
  0xf3   : > { %v526_v63 = vpack.c.bf16 %v495_v61, %v494_v60 }
  0xf4   : > { %v489_v0 = vpop.f32.mrf.mxu3 }
  0xf5   : > { %597 = vmatmul.bf16.gmra.mxu1 %v526_v63  ;;  %v490_v2 = vadd.f32 %v1555_v41, %v489_v0 }
  0xf6   : > { %v462_v3 = vpop.f32.mrf.mxu0 }
  0xf7   : > { %v507_v4 = vmax.f32 %v490_v2, 0.0  ;;  %v463_v6 = vadd.f32 %v1555_v41, %v462_v3 }
  0xf9   : > { %v532_v5 = vpack.c.bf16 %v507_v4, %v506_v1  ;;  %v496_v9 = vmax.f32 %v463_v6, 0.0 }
  0xfb   : > { %627 = vmatmul.bf16.gmra.mxu3 %v532_v5 }
  0xfe   : > { %v464_v7 = vpop.f32.mrf.mxu0 }
  0xff   : > { %v465_v8 = vadd.f32 %v1555_v41, %v464_v7 }
 0x101   : > { %v497_v10 = vmax.f32 %v465_v8, 0.0 }
 0x103   : > { %v527_v11 = vpack.c.bf16 %v497_v10, %v496_v9 }
 0x105   : > { %602 = vmatmul.bf16.gmra.mxu1 %v527_v11 }
 0x106   : > { %v467_v12 = vpop.f32.mrf.mxu0 }
 0x107   : > { %v468_v13 = vadd.f32 %v1555_v41, %v467_v12 }
 0x109   : > { %v498_v16 = vmax.f32 %v468_v13, 0.0 }
 0x10e   : > { %v469_v14 = vpop.f32.mrf.mxu0 }
 0x10f   : > { %v470_v15 = vadd.f32 %v1555_v41, %v469_v14 }
 0x111   : > { %v499_v17 = vmax.f32 %v470_v15, 0.0 }
 0x113   : > { %v528_v18 = vpack.c.bf16 %v499_v17, %v498_v16 }
 0x115   : > { %607 = vmatmul.bf16.gmra.mxu1 %v528_v18 }
 0x116   : > { %v472_v20 = vpop.f32.mrf.mxu0 }
 0x117   : > { %v473_v23 = vadd.f32 %v1555_v41, %v472_v20 }
 0x119   : > { %v500_v27 = vmax.f32 %v473_v23, 0.0 }
 0x11e   : > { %v474_v24 = vpop.f32.mrf.mxu0 }
 0x11f   : > { %v475_v25 = vadd.f32 %v1555_v41, %v474_v24 }
 0x121   : > { %v501_v28 = vmax.f32 %v475_v25, 0.0 }
 0x123   : > { %v529_v29 = vpack.c.bf16 %v501_v28, %v500_v27 }
 0x125   : > { %612 = vmatmul.bf16.gmra.mxu1 %v529_v29 }
 0x126   : > { %v477_v30 = vpop.f32.mrf.mxu0 }
 0x127   : > { %v478_v31 = vadd.f32 %v1555_v41, %v477_v30 }
 0x129   : > { %v502_v34 = vmax.f32 %v478_v31, 0.0 }
 0x12e   : > { %v479_v32 = vpop.f32.mrf.mxu0 }
 0x12f   : > { %v480_v33 = vadd.f32 %v1555_v41, %v479_v32  ;;  %v1158_v41 = vld [vmem:[%s1637_s4] ss:$0 sm:$0xff] }
 0x131   : > { %v503_v35 = vmax.f32 %v480_v33, 0.0 }
 0x133   : > { %v530_v36 = vpack.c.bf16 %v503_v35, %v502_v34  ;;  %v1159_v34 = vld [vmem:[%s1639_s6] ss:$0 sm:$0xff] }
 0x135   : > { %617 = vmatmul.bf16.gmra.mxu1 %v530_v36 }
 0x162   : > { %v593_v42 = vpop.f32.mrf.mxu1 }
 0x163   : > { %v594_v43 = vadd.f32 %v1158_v41, %v593_v42 }
 0x165   : > { %v633_v46 = vmax.f32 %v594_v43, 0.0 }
 0x16a   : > { %v595_v44 = vpop.f32.mrf.mxu1 }
 0x16b   : > { %v596_v45 = vadd.f32 %v1158_v41, %v595_v44 }
 0x16d   : > { %v634_v47 = vmax.f32 %v596_v45, 0.0 }
 0x16e   : > { %v623_v48 = vpop.f32.mrf.mxu3 }
 0x16f   : > { %v666_v49 = vpack.c.bf16 %v634_v47, %v633_v46  ;;  %v624_v51 = vadd.f32 %v1158_v41, %v623_v48 }
 0x171   : > { %733 = vmatmul.bf16.vlgmr.msra.gmra.mxu2 %v666_v49  ;;  %v645_v53 = vmax.f32 %v624_v51, 0.0 }
 0x172   : > { %v598_v50 = vpop.f32.mrf.mxu1 }
 0x173   : > { %v599_v55 = vadd.f32 %v1158_v41, %v598_v50 }
 0x175   : > { %v635_v60 = vmax.f32 %v599_v55, 0.0 }
 0x176   : > { %v625_v52 = vpop.f32.mrf.mxu3 }
 0x177   : > { %v626_v54 = vadd.f32 %v1158_v41, %v625_v52 }
 0x179   : > { %v646_v56 = vmax.f32 %v626_v54, 0.0 }
 0x17a   : > { %v600_v57 = vpop.f32.mrf.mxu1 }
 0x17b   : > { %v601_v58 = vadd.f32 %v1158_v41, %v600_v57  ;;  %v672_v59 = vpack.c.bf16 %v646_v56, %v645_v53 }
 0x17d   : > { %v636_v61 = vmax.f32 %v601_v58, 0.0  ;;  %763 = vmatmul.bf16.vlgmr.msra.gmra.mxu3 %v672_v59 }
 0x17e   : > { %v628_v62 = vpop.f32.mrf.mxu3 }
 0x17f   : > { %v667_v63 = vpack.c.bf16 %v636_v61, %v635_v60  ;;  %v629_v1 = vadd.f32 %v1158_v41, %v628_v62 }
 0x181   : > { %738 = vmatmul.bf16.gmra.mxu2 %v667_v63  ;;  %v647_v3 = vmax.f32 %v629_v1, 0.0 }
 0x182   : > { %v603_v0 = vpop.f32.mrf.mxu1 }
 0x183   : > { %v604_v5 = vadd.f32 %v1158_v41, %v603_v0 }
 0x185   : > { %v637_v10 = vmax.f32 %v604_v5, 0.0 }
 0x186   : > { %v630_v2 = vpop.f32.mrf.mxu3 }
 0x187   : > { %v631_v4 = vadd.f32 %v1158_v41, %v630_v2 }
 0x189   : > { %v648_v6 = vmax.f32 %v631_v4, 0.0 }
 0x18a   : > { %v605_v7 = vpop.f32.mrf.mxu1 }
 0x18b   : > { %v606_v8 = vadd.f32 %v1158_v41, %v605_v7  ;;  %v673_v9 = vpack.c.bf16 %v648_v6, %v647_v3 }
 0x18d   : > { %v638_v11 = vmax.f32 %v606_v8, 0.0  ;;  %768 = vmatmul.bf16.gmra.mxu3 %v673_v9 }
 0x18f   : > { %v668_v12 = vpack.c.bf16 %v638_v11, %v637_v10 }
 0x191   : > { %743 = vmatmul.bf16.gmra.mxu2 %v668_v12 }
 0x192   : > { %v608_v13 = vpop.f32.mrf.mxu1 }
 0x193   : > { %v609_v14 = vadd.f32 %v1158_v41, %v608_v13 }
 0x195   : > { %v639_v17 = vmax.f32 %v609_v14, 0.0 }
 0x19a   : > { %v610_v15 = vpop.f32.mrf.mxu1 }
 0x19b   : > { %v611_v16 = vadd.f32 %v1158_v41, %v610_v15 }
 0x19d   : > { %v640_v18 = vmax.f32 %v611_v16, 0.0 }
 0x19f   : > { %v669_v19 = vpack.c.bf16 %v640_v18, %v639_v17 }
 0x1a1   : > { %748 = vmatmul.bf16.gmra.mxu2 %v669_v19 }
 0x1a2   : > { %v613_v20 = vpop.f32.mrf.mxu1 }
 0x1a3   : > { %v614_v21 = vadd.f32 %v1158_v41, %v613_v20 }
 0x1a5   : > { %v641_v24 = vmax.f32 %v614_v21, 0.0 }
 0x1aa   : > { %v615_v22 = vpop.f32.mrf.mxu1 }
 0x1ab   : > { %v616_v23 = vadd.f32 %v1158_v41, %v615_v22 }
 0x1ad   : > { %v642_v25 = vmax.f32 %v616_v23, 0.0 }
 0x1af   : > { %v670_v26 = vpack.c.bf16 %v642_v25, %v641_v24 }
 0x1b1   : > { %753 = vmatmul.bf16.gmra.mxu2 %v670_v26 }
 0x1b2   : > { %v618_v27 = vpop.f32.mrf.mxu1 }
 0x1b3   : > { %v619_v28 = vadd.f32 %v1158_v41, %v618_v27 }
 0x1b5   : > { %v643_v31 = vmax.f32 %v619_v28, 0.0 }
 0x1ba   : > { %v620_v29 = vpop.f32.mrf.mxu1 }
 0x1bb   : > { %v621_v30 = vadd.f32 %v1158_v41, %v620_v29 }
 0x1bd   : > { %v644_v32 = vmax.f32 %v621_v30, 0.0 }
 0x1bf   : > { %v671_v33 = vpack.c.bf16 %v644_v32, %v643_v31 }
 0x1c1   : > { %758 = vmatmul.bf16.gmra.mxu2 %v671_v33 }
 0x1f4   : > { %v734_v35 = vpop.f32.mrf.mxu2 }
 0x1f5   : > { %v735_v36 = vadd.f32 %v1159_v34, %v734_v35 }
 0x1f7   : > { %774 = vst [vmem:[%s1581_s23] sm:$0xff] %v735_v36 }
 0x1fc   : > { %v736_v37 = vpop.f32.mrf.mxu2 }
 0x1fd   : > { %v737_v38 = vadd.f32 %v1159_v34, %v736_v37 }
 0x1ff   : > { %775 = vst [vmem:[%s1581_s23 + $0x8] sm:$0xff] %v737_v38 }
 0x200   : > { %v764_v39 = vpop.f32.mrf.mxu3 }
 0x201   : > { %v765_v40 = vadd.f32 %v1159_v34, %v764_v39 }
 0x203   : > { %786 = vst [vmem:[%s1581_s23 + $0x60] sm:$0xff] %v765_v40 }
 0x204   : > { %v739_v42 = vpop.f32.mrf.mxu2 }
 0x205   : > { %v740_v41 = vadd.f32 %v1159_v34, %v739_v42 }
 0x207   : > { %776 = vst [vmem:[%s1581_s23 + $0x10] sm:$0xff] %v740_v41 }
 0x208   : > { %v766_v43 = vpop.f32.mrf.mxu3 }
 0x209   : > { %v767_v44 = vadd.f32 %v1159_v34, %v766_v43 }
 0x20b   : > { %787 = vst [vmem:[%s1581_s23 + $0x68] sm:$0xff] %v767_v44 }
 0x20c   : > { %v741_v45 = vpop.f32.mrf.mxu2 }
 0x20d   : > { %v742_v46 = vadd.f32 %v1159_v34, %v741_v45 }
 0x20f   : > { %777 = vst [vmem:[%s1581_s23 + $0x18] sm:$0xff] %v742_v46 }
 0x210   : > { %v769_v47 = vpop.f32.mrf.mxu3 }
 0x211   : > { %v770_v48 = vadd.f32 %v1159_v34, %v769_v47 }
 0x213   : > { %788 = vst [vmem:[%s1581_s23 + $0x70] sm:$0xff] %v770_v48 }
 0x214   : > { %v744_v49 = vpop.f32.mrf.mxu2 }
 0x215   : > { %v745_v50 = vadd.f32 %v1159_v34, %v744_v49 }
 0x217   : > { %778 = vst [vmem:[%s1581_s23 + $0x20] sm:$0xff] %v745_v50 }
 0x218   : > { %v771_v51 = vpop.f32.mrf.mxu3 }
 0x219   : > { %v772_v52 = vadd.f32 %v1159_v34, %v771_v51 }
 0x21b   : > { %789 = vst [vmem:[%s1581_s23 + $0x78] sm:$0xff] %v772_v52 }
 0x21c   : > { %v746_v53 = vpop.f32.mrf.mxu2 }
 0x21d   : > { %v747_v54 = vadd.f32 %v1159_v34, %v746_v53 }
 0x21f   : > { %779 = vst [vmem:[%s1581_s23 + $0x28] sm:$0xff] %v747_v54 }
 0x224   : > { %v749_v55 = vpop.f32.mrf.mxu2 }
 0x225   : > { %v750_v56 = vadd.f32 %v1159_v34, %v749_v55 }
 0x227   : > { %780 = vst [vmem:[%s1581_s23 + $0x30] sm:$0xff] %v750_v56 }
 0x22c   : > { %v751_v57 = vpop.f32.mrf.mxu2 }
 0x22d   : > { %v752_v58 = vadd.f32 %v1159_v34, %v751_v57 }
 0x22f   : > { %781 = vst [vmem:[%s1581_s23 + $0x38] sm:$0xff] %v752_v58 }
 0x234   : > { %v754_v59 = vpop.f32.mrf.mxu2 }
 0x235   : > { %v755_v60 = vadd.f32 %v1159_v34, %v754_v59 }
 0x237   : > { %782 = vst [vmem:[%s1581_s23 + $0x40] sm:$0xff] %v755_v60 }
 0x23c   : > { %v756_v61 = vpop.f32.mrf.mxu2 }
 0x23d   : > { %v757_v62 = vadd.f32 %v1159_v34, %v756_v61 }
 0x23f   : > { %783 = vst [vmem:[%s1581_s23 + $0x48] sm:$0xff] %v757_v62 }
 0x244   : > { %v759_v63 = vpop.f32.mrf.mxu2 }
 0x245   : > { %v760_v0 = vadd.f32 %v1159_v34, %v759_v63 }
 0x247   : > { %784 = vst [vmem:[%s1581_s23 + $0x50] sm:$0xff] %v760_v0 }
 0x24c   : > { %v761_v1 = vpop.f32.mrf.mxu2 }
 0x24d   : > { %v762_v2 = vadd.f32 %v1159_v34, %v761_v1 }
 0x24f   : > { %785 = vst [vmem:[%s1581_s23 + $0x58] sm:$0xff] %v762_v2 }
 0x250   : > { %1307 = shalt.err (!%p1304_p10)
}
 0x251   : > { %s1363_s22 = smov 128   ;;  %s1364_s23 = smov 8  }
 0x252   : > { %1088 = dma.vmem_to_hbm [thread:$0]  (%p1488_p7), %s804_s16, 2048, %s806_s1, %s791_s15, %s1363_s22, %s1363_s22, %s1364_s23  }
 0x253 PF: > { %s820_s19 = sand.u32 1, %s1342_s24   ;;  %p1649_p12 = scmp.ge.s32.totalorder %s1354_s27, 2 }
 0x254   : > { %s821_s20 = scalar_lea.sflag [#allocation4], %s820_s19 }
 0x255   : > { %p1105_p13 = pnand %p1649_p12, %p1440_p6 }
 0x257   : > { %p1106_p0 = pneg %p1105_p13 }
 0x259   : > { %1337 = dma.done.wait (%p1106_p0), %s821_s20, 2048  }
 0x25a   : > { %1339 = vsyncadd (%p1106_p0), %s821_s20, 4294965248  ;;  %p22_p3 = scmp.ge.s32.totalorder %s1472_s11, 4   ;;  %s1650_s24 = smov %s1346_s25 }
 0x25b   : > { %s1651_s25 = smov %s1350_s26  ;;  %s1652_s26 = smov %s1484_s17 }
 0x25c   : > { %s1653_s27 = smov %s1472_s11  ;;  %24 = sbr.rel (!%p22_p3) target bundleno = 9 (0x9), region = 105 }
 0x261   :  { %827 = vsyncpa [#allocation3], 1 }
 0x262   :  { %829 = vsyncpa [#allocation3 + $0x1], 1 }
 0x263   :  { %830 = vsyncpa [#allocation6], 1 }
 0x264   :  { %831 = vsyncpa [#allocation9], 1 }
 0x265   :  { %832 = vsyncpa [#allocation4], 1 }
 0x266   :  { %834 = vsyncpa [#allocation4 + $0x1], 1 }

</bundles_post_ra>
